<compile_context>
chip_gen: v7x
topology: tpu7x:2x2x1
jax: 0.10.0
libtpu: 0.0.40
codegen_flags: <defaults>
</compile_context>

<pallas_src>
import jax
import jax.numpy as jnp
from jax.experimental import pallas as pl
from jax.experimental.pallas import tpu as pltpu

_LANES = 128
_SUBLANES = 8


def _cdiv(a, b):
    return (a + b - 1) // b


def _round_up(a, b):
    return _cdiv(a, b) * b


def _l1_partial_kernel(pred_ref, label_ref, psum_ref, acc_ref):
    """Grid: (Bp // TB, R // TR).

    pred_ref  : VMEM (TB, TR, 128)  prediction tile (input dtype)
    label_ref : VMEM (TB, TR, 128)  label tile (input dtype; -1 marks padding)
    psum_ref  : VMEM (TB, 1, 1)     f32 per-sentence |diff| sums (written once)
    acc_ref   : VMEM (TB, 1, 128)   f32 lane-shaped accumulator scratch
    """
    s = pl.program_id(1)

    @pl.when(s == 0)
    def _():
        acc_ref[...] = jnp.zeros_like(acc_ref)

    labels = label_ref[...]
    preds = pred_ref[...]

    # Elementwise in the input dtype (bf16-native on v6e/v7x).  Masking once on
    # |p - l| is equivalent to |m*p - m*l| for a 0/1 mask; padded entries
    # (label == -1) contribute zero.
    d = jnp.abs(preds - labels)
    d = jnp.where(labels != -1.0, d, jnp.zeros_like(d))

    # Upcast to f32 only at accumulation; reduce over rows (sublanes) only —
    # the cross-lane reduce is deferred to the final row tile.
    acc_ref[...] += jnp.sum(d.astype(jnp.float32), axis=1, keepdims=True)

    @pl.when(s == pl.num_programs(1) - 1)
    def _():
        psum_ref[...] = jnp.sum(acc_ref[...], axis=(1, 2), keepdims=True)


def _vmem_ceiling_bytes():
    """~75% of physical VMEM; 48 MiB fallback (safe for v7x's 64 MiB/TC)."""
    try:
        cap = getattr(pltpu.get_tpu_info(), "vmem_capacity_bytes", None)
        if cap:
            return max(int(cap) * 3 // 4, 16 << 20)
    except Exception:
        pass
    return 48 << 20


def _choose_tiles(B, R, row_bytes, target_block_bytes):
    """Pick (TB sentences, TR 128-lane rows) per grid step.

    Per-input block ~= TB * TR * row_bytes <= target_block_bytes, with TR a
    multiple of 8 (whole (8,128) vregs).  TB is capped so the "parallel"
    batch axis keeps >= 2 tiles whenever B >= 2 (v7x megacore balance).
    """
    sent_bytes = R * row_bytes
    if sent_bytes <= target_block_bytes:
        # Small sentences: batch several flattened sentences per step.
        tr = R
        tb = int(min(B, max(1, target_block_bytes // sent_bytes)))
        tb = min(tb, max(1, (B + 1) // 2))        # >= 2 batch tiles if B >= 2
        tb = _cdiv(B, _cdiv(B, tb))               # rebalance (minimal padding)
    else:
        # Large sentences: one sentence per step, row-tile it (multiple of 8),
        # balancing tile sizes so per-sentence padding stays small.
        tb = 1
        max_rows = max(_SUBLANES,
                       (target_block_bytes // row_bytes) // _SUBLANES * _SUBLANES)
        n_tiles = _cdiv(R, max_rows)
        tr = _round_up(_cdiv(R, n_tiles), _SUBLANES)
    return tb, tr


def l1_distance_loss(predictions, label_batch, length_batch, *,
                     target_block_bytes=8 * 1024 * 1024):
    """Pallas implementation of L1DistanceLoss.forward.

    Returns (batch_loss, total_sents) as float32 scalars.
    """
    B, S, S2 = predictions.shape
    assert S == S2 and label_batch.shape == (B, S, S)
    assert length_batch.shape == (B,)
    lengths = length_batch.astype(jnp.int32)

    pred_is = jnp.dtype(predictions.dtype).itemsize
    label_is = jnp.dtype(label_batch.dtype).itemsize
    itemsize = max(pred_is, label_is)

    vmem_ceiling = _vmem_ceiling_bytes()
    # 2 inputs x 2 pipeline buffers (+ scratch/output/headroom) must fit.
    target = min(int(target_block_bytes), vmem_ceiling // 6)
    target = max(target, _SUBLANES * _LANES * itemsize)

    # Lane-dense layout: flatten each (S, S) matrix to R rows of 128 lanes.
    L = S * S
    row_bytes = _LANES * itemsize
    R0 = _round_up(_cdiv(L, _LANES), _SUBLANES)

    tb, tr = _choose_tiles(B, R0, row_bytes, target)
    R = _round_up(R0, tr)
    Lp = R * _LANES
    bp = _round_up(B, tb)

    preds_f = predictions.reshape(B, L)
    labels_f = label_batch.reshape(B, L)
    if Lp != L or bp != B:
        preds_f = jnp.pad(preds_f, ((0, bp - B), (0, Lp - L)))
        # Padded entries / sentences carry label == -1, so they are masked out.
        labels_f = jnp.pad(labels_f, ((0, bp - B), (0, Lp - L)),
                           constant_values=-1.0)
    preds_f = preds_f.reshape(bp, R, _LANES)
    labels_f = labels_f.reshape(bp, R, _LANES)

    # Exact physical sizes (layout is already (8,128)-dense).
    in_block_bytes = tb * tr * _LANES * (pred_is + label_is)
    acc_bytes = tb * _SUBLANES * _LANES * 4     # (TB,1,128) pads to 8 sublanes
    vmem_limit = int(min(max(2 * in_block_bytes + acc_bytes + (2 << 20),
                             16 << 20),
                         vmem_ceiling))

    bytes_in = bp * R * _LANES * (pred_is + label_is)

    partials = pl.pallas_call(
        _l1_partial_kernel,
        out_shape=jax.ShapeDtypeStruct((bp, 1, 1), jnp.float32),
        grid=(bp // tb, R // tr),
        in_specs=[
            pl.BlockSpec((tb, tr, _LANES), lambda b, s: (b, s, 0)),
            pl.BlockSpec((tb, tr, _LANES), lambda b, s: (b, s, 0)),
        ],
        out_specs=pl.BlockSpec((tb, 1, 1), lambda b, s: (b, 0, 0)),
        scratch_shapes=[pltpu.VMEM((tb, 1, _LANES), jnp.float32)],
        compiler_params=pltpu.CompilerParams(
            dimension_semantics=("parallel", "arbitrary"),
            vmem_limit_bytes=vmem_limit,
        ),
        cost_estimate=pl.CostEstimate(
            flops=5 * bp * R * _LANES,          # sub/abs/cmp/select/add
            transcendentals=0,
            bytes_accessed=bytes_in + bp * 4,
        ),
    )(preds_f, labels_f)

    loss_per_sent = partials[:B, 0, 0]                      # (B,) f32
    lengths_f = lengths.astype(jnp.float32)
    sq_len = lengths_f * lengths_f
    # Matches torch semantics (length == 0 -> inf/nan in the normalized sum).
    normalized = loss_per_sent / sq_len
    total_sents = jnp.sum(lengths != 0).astype(jnp.float32)
    batch_loss = jnp.where(total_sents > 0,
                           jnp.sum(normalized) / total_sents,
                           jnp.float32(0.0))
    return batch_loss, total_sents


def _reference(predictions, label_batch, length_batch):
    """Pure-JAX reference mirroring the PyTorch module (f32 math)."""
    predictions = predictions.astype(jnp.float32)
    label_batch = label_batch.astype(jnp.float32)
    labels_1s = (label_batch != -1).astype(jnp.float32)
    preds_m = predictions * labels_1s
    labels_m = label_batch * labels_1s
    total_sents = jnp.sum(length_batch != 0).astype(jnp.float32)
    sq_len = length_batch.astype(jnp.float32) ** 2
    loss_per_sent = jnp.sum(jnp.abs(preds_m - labels_m), axis=(1, 2))
    normalized = loss_per_sent / sq_len
    batch_loss = jnp.where(total_sents > 0,
                           jnp.sum(normalized) / total_sents,
                           jnp.float32(0.0))
    return batch_loss, total_sents


if __name__ == "__main__":
    def make_case(key, B, S, lengths, dtype=jnp.float32):
        k_pred, k_lab = jax.random.split(key)
        preds = jax.random.uniform(k_pred, (B, S, S), jnp.float32, 0.0, 5.0)
        labels = jax.random.uniform(k_lab, (B, S, S), jnp.float32, 0.0, 5.0)
        preds = preds.astype(dtype)
        labels = labels.astype(dtype)
        lengths = jnp.asarray(lengths, jnp.int32)
        idx = jnp.arange(S)
        valid = (idx[None, :, None] < lengths[:, None, None]) & \
                (idx[None, None, :] < lengths[:, None, None])
        labels = jnp.where(valid, labels, jnp.asarray(-1.0, dtype))
        return preds, labels, lengths

    def check(name, preds, labels, lengths, rtol=1e-4, atol=1e-4, **kw):
        loss, sents = l1_distance_loss(preds, labels, lengths, **kw)
        jax.block_until_ready((loss, sents))
        rloss, rsents = _reference(preds, labels, lengths)
        assert jnp.allclose(loss, rloss, rtol=rtol, atol=atol), \
            (name, loss, rloss)
        assert jnp.allclose(sents, rsents), (name, sents, rsents)

    root = jax.random.PRNGKey(0)
    k1, k2, k3, k4 = jax.random.split(root, 4)

    # 1) Primary small case: B=2, S=16 -> lane-padded flatten (256 -> 1024),
    #    two batch tiles (megacore-balanced), single row tile.
    check("f32_small", *make_case(k1, 2, 16, [16, 10]))

    # 2) Row-tiled accumulation: B=3, S=72 with a tiny block budget ->
    #    TB=1, TR=8, grid=(3, 6), exercises the resident accumulator.
    check("f32_rowtiled", *make_case(k2, 3, 72, [72, 31, 50]),
          target_block_bytes=4096)

    # 3) TB>1 and batch padding: B=5, S=24, default budget -> TB=3, Bp=6.
    check("f32_batched", *make_case(k3, 5, 24, [24, 7, 13, 24, 1]))

    # 4) bf16 inputs: bf16-native elementwise, f32 accumulation in the kernel.
    check("bf16_small", *make_case(k4, 3, 16, [16, 5, 9], dtype=jnp.bfloat16),
          rtol=5e-3, atol=1e-3)

    print("KERNEL_OK")
</pallas_src>

<mosaic_0001>
module attributes {stable_mosaic.version = 11 : i64} {
  func.func @_l1_partial_kernel(%arg0: i32, %arg1: i32, %arg2: memref<1x8x128xf32, #tpu.memory_space<vmem>>, %arg3: memref<1x8x128xf32, #tpu.memory_space<vmem>>, %arg4: memref<1x1x1xf32, #tpu.memory_space<vmem>>, %arg5: memref<1x1x128xf32, #tpu.memory_space<vmem>>) attributes {dimension_semantics = [#tpu.dimension_semantics<parallel>, #tpu.dimension_semantics<arbitrary>], iteration_bounds = array<i64: 2, 1>, scalar_prefetch = 0 : i64, scratch_operands = 1 : i64, tpu.core_type = #tpu.core_type<tc>, window_params = [{transform_indices = @transform_0, window_bounds = array<i64: 1, 8, 128>}, {transform_indices = @transform_1, window_bounds = array<i64: 1, 8, 128>}, {transform_indices = @transform_2, window_bounds = array<i64: 1, 1, 1>}]} {
    %c0_i32 = arith.constant 0 : i32
    %0 = arith.cmpi eq, %arg1, %c0_i32 : i32
    %1 = arith.extui %0 : i1 to i32
    %c0_i32_0 = arith.constant 0 : i32
    %2 = arith.cmpi ne, %1, %c0_i32_0 : i32
    scf.if %2 {
      %cst_16 = arith.constant 0.000000e+00 : f32
      %19 = vector.broadcast %cst_16 : f32 to vector<1x1x128xf32>
      %c0_17 = arith.constant 0 : index
      %c0_18 = arith.constant 0 : index
      %c0_19 = arith.constant 0 : index
      %20 = vector.load %arg5[%c0_17, %c0_18, %c0_19] : memref<1x1x128xf32, #tpu.memory_space<vmem>>, vector<1x1x128xf32>
      tpu.vector_store %arg5[%c0_17, %c0_18, %c0_19], %19 {strides = array<i32>} : memref<1x1x128xf32, #tpu.memory_space<vmem>>, vector<1x1x128xf32>,
    } else {
    }
    %c0 = arith.constant 0 : index
    %c0_1 = arith.constant 0 : index
    %c0_2 = arith.constant 0 : index
    %3 = vector.load %arg3[%c0, %c0_1, %c0_2] : memref<1x8x128xf32, #tpu.memory_space<vmem>>, vector<1x8x128xf32>
    %c0_3 = arith.constant 0 : index
    %c0_4 = arith.constant 0 : index
    %c0_5 = arith.constant 0 : index
    %4 = vector.load %arg2[%c0_3, %c0_4, %c0_5] : memref<1x8x128xf32, #tpu.memory_space<vmem>>, vector<1x8x128xf32>
    %5 = arith.subf %4, %3 : vector<1x8x128xf32>
    %6 = math.absf %5 : vector<1x8x128xf32>
    %cst = arith.constant -1.000000e+00 : f32
    %7 = vector.broadcast %cst : f32 to vector<1x8x128xf32>
    %8 = arith.cmpf one, %3, %7 : vector<1x8x128xf32>
    %cst_6 = arith.constant 0.000000e+00 : f32
    %9 = vector.broadcast %cst_6 : f32 to vector<1x8x128xf32>
    %10 = arith.select %8, %6, %9 : vector<1x8x128xi1>, vector<1x8x128xf32>
    %c0_7 = arith.constant 0 : index
    %c0_8 = arith.constant 0 : index
    %c0_9 = arith.constant 0 : index
    %11 = vector.load %arg5[%c0_7, %c0_8, %c0_9] : memref<1x1x128xf32, #tpu.memory_space<vmem>>, vector<1x1x128xf32>
    %cst_10 = arith.constant dense<0.000000e+00> : vector<1x128xf32>
    %12 = vector.multi_reduction <add>, %10, %cst_10 [1] : vector<1x8x128xf32> to vector<1x128xf32>
    %13 = vector.shape_cast %12 : vector<1x128xf32> to vector<1x1x128xf32>
    %14 = arith.addf %11, %13 : vector<1x1x128xf32>
    %c0_11 = arith.constant 0 : index
    %c0_12 = arith.constant 0 : index
    %c0_13 = arith.constant 0 : index
    %15 = vector.load %arg5[%c0_11, %c0_12, %c0_13] : memref<1x1x128xf32, #tpu.memory_space<vmem>>, vector<1x1x128xf32>
    tpu.vector_store %arg5[%c0_11, %c0_12, %c0_13], %14 {strides = array<i32>} : memref<1x1x128xf32, #tpu.memory_space<vmem>>, vector<1x1x128xf32>,
    %c0_i32_14 = arith.constant 0 : i32
    %16 = arith.cmpi eq, %arg1, %c0_i32_14 : i32
    %17 = arith.extui %16 : i1 to i32
    %c0_i32_15 = arith.constant 0 : i32
    %18 = arith.cmpi ne, %17, %c0_i32_15 : i32
    scf.if %18 {
      %c0_16 = arith.constant 0 : index
      %c0_17 = arith.constant 0 : index
      %c0_18 = arith.constant 0 : index
      %19 = vector.load %arg5[%c0_16, %c0_17, %c0_18] : memref<1x1x128xf32, #tpu.memory_space<vmem>>, vector<1x1x128xf32>
      %cst_19 = arith.constant dense<0.000000e+00> : vector<1xf32>
      %20 = vector.multi_reduction <add>, %19, %cst_19 [1, 2] : vector<1x1x128xf32> to vector<1xf32>
      %21 = vector.shape_cast %20 : vector<1xf32> to vector<1x1x1xf32>
      %c0_20 = arith.constant 0 : index
      %c0_21 = arith.constant 0 : index
      %c0_22 = arith.constant 0 : index
      %22 = vector.load %arg4[%c0_20, %c0_21, %c0_22] : memref<1x1x1xf32, #tpu.memory_space<vmem>>, vector<1x1x1xf32>
      tpu.vector_store %arg4[%c0_20, %c0_21, %c0_22], %21 {strides = array<i32>} : memref<1x1x1xf32, #tpu.memory_space<vmem>>, vector<1x1x1xf32>,
    } else {
    }
    return
  }
  func.func @transform_0(%arg0: i32, %arg1: i32) -> (i32, i32, i32) {
    %c0_i32 = arith.constant 0 : i32
    %c0_i32_0 = arith.constant 0 : i32
    return %arg0, %arg1, %c0_i32 : i32, i32, i32
  }
  func.func @transform_1(%arg0: i32, %arg1: i32) -> (i32, i32, i32) {
    %c0_i32 = arith.constant 0 : i32
    %c0_i32_0 = arith.constant 0 : i32
    return %arg0, %arg1, %c0_i32 : i32, i32, i32
  }
  func.func @transform_2(%arg0: i32, %arg1: i32) -> (i32, i32, i32) {
    %c0_i32 = arith.constant 0 : i32
    %c0_i32_0 = arith.constant 0 : i32
    %c0_i32_1 = arith.constant 0 : i32
    return %arg0, %c0_i32, %c0_i32_0 : i32, i32, i32
  }
}

</mosaic_0001>

<bundles_post_ra>
// kernel: tpu_custom_call.1
= control target key start
LH: loop header
LB: loop body
LE: loop exit
PB: predicated region body
PF: predicated region fallthrough
CT: control target
= control target key end

     0   :  { %7 = vsyncpa [#allocation4], 0  ;;  %s720_s0 = inlined_call_operand.hbm [shape: f32[2,8,128], index: 0, kind: input, shape index: {}]   ;;  %s721_s1 = inlined_call_operand.hbm [shape: f32[2,8,128], index: 1, kind: input, shape index: {}]   ;;  %s722_s2 = inlined_call_operand.vmem [shape: f32[2,1,1], index: 2, kind: output, shape index: {}]  }
   0x1   :  { %9 = vsyncpa [#allocation4 + $0x1], 0 }
   0x2   :  { %10 = vsyncpa [#allocation6], 0 }
   0x3   :  { %12 = vsyncpa [#allocation6 + $0x1], 0  ;;  %s548_s9 = smov 0   ;;  %s550_s10 = smov 0  }
   0x4   :  { %s552_s11 = smov 0   ;;  %s554_s12 = smov 0  }
   0x5   :  { %s556_s13 = smov 0   ;;  %s558_s14 = smov 0  }
   0x6 LB: > { %s340_s15 = sadd.s32 4294967295, %s528_s14   ;;  %s30_s16 = sadd.s32 1, %s524_s13  ;;  %s528_s14 = sphi %s558_s14, %s18_s14   ;;  %s524_s13 = sphi %s556_s13, %s736_s13   ;;  %s520_s12 = sphi %s554_s12, %s735_s12   ;;  %s516_s11 = sphi %s552_s11, %s734_s11   ;;  %s512_s10 = sphi %s550_s10, %s733_s10   ;;  %s508_s9 = sphi %s548_s9, %s732_s9  }
   0x7   : > { %p32_p0 = scmp.ge.s32.totalorder %s30_s16, 2  ;;  %s39_s17 = sadd.s32 1, %s516_s11 }
   0x8   : > { %p46_p1 = scmp.ne.s32.totalorder %s516_s11, %s512_s10  ;;  %p47_p2 = scmp.eq.s32.totalorder %s528_s14, 0 }
   0x9   : > { %s738_s16 = smov (%p32_p0, %s30_s16), 0  ;;  %p52_p4 = scmp.ne.s32.totalorder %s512_s10, %s508_s9 }
   0xa   : > { %p584_p3 = por %p47_p2, %p46_p1  ;;  %s34_s19 = ssub.s32 %s524_s13, %s738_s16 }
   0xb   : > { %p53_p5 = scmp.eq.s32.totalorder %s340_s15, 0  ;;  %p37_p6 = scmp.eq.s32.totalorder %s34_s19, 0 }
   0xc   : > { %p364_p8 = scmp.lt.s32.totalorder %s528_s14, 2  ;;  %s600_s22 = sand.u32 1, %s516_s11  }
   0xd   : > { %p591_p7 = por %p53_p5, %p52_p4  ;;  %s345_s23 = sshll.u32 %s524_s13, 7 }
   0xe   : > { %s597_s21 = scalar_select %p37_p6, %s516_s11, %s39_s17  }
   0xf   : > { %s725_s20 = scalar_select %p591_p7, 1, 0 }
  0x10   : > { %s344_s24 = sshll.u32 %s600_s22, 3  ;;  %s609_s27 = scalar_lea.hbm %s720_s0, %s345_s23 }
  0x11   : > { %s134_s28 = scalar_lea.vmem [#allocation3], %s344_s24  ;;  %p615_p9 = pnand %p364_p8, %p584_p3 }
  0x12   : > { %s142_s29 = sshll.u32 %s134_s28, 4  ;;  %s131_s3 = scalar_lea.sflag [#allocation4], %s600_s22  ;;  %s619_s29 = int_to_ptr.vmem [resolvable:$true] %s142_s29 }
  0x13   : > { %s414_s4 = scalar_lea.hbm %s609_s27, 128  ;;  %p416_p13 = pneg %p615_p9 }
  0x14   : > { %p415_p12 = scmp.ne.s32.totalorder %s609_s27, %s414_s4  ;;  %s419_s7 = scalar_lea.hbm %s720_s0, 256 }
  0x15   : > { %p420_p2 = scmp.lt.u32.totalorder %s609_s27, %s720_s0  ;;  %p421_p3 = scmp.lt.u32.totalorder %s419_s7, %s414_s4 }
  0x16   : > { %p417_p0 = pnand %p416_p13, %p415_p12  ;;  %p423_p5 = scmp.lt.u32.totalorder %s414_s4, %s609_s27 }
  0x17   : > { %p422_p4 = por %p421_p3, %p420_p2 }
  0x18   : > { %p418_p1 = pneg %p417_p0 }
  0x19   : > { %p424_p6 = por %p423_p5, %p422_p4 }
  0x1b   : > { %p425_p8 = pnand %p424_p6, %p418_p1 }
  0x1d   : > { %428 = shalt.err (!%p425_p8)
}
  0x1e   : > { %s429_s15 = scalar_lea.vmem %s619_s29, 128  ;;  %s530_s17 = smov [#allocation3]  }
  0x1f   : > { %p430_p12 = scmp.ne.s32.totalorder %s619_s29, %s429_s15  ;;  %s434_s18 = sshll.u32 %s530_s17, 4  ;;  %s435_s18 = int_to_ptr.vmem [resolvable:$false] %s434_s18 }
  0x20   : > { %s436_s19 = scalar_lea.vmem %s435_s18, 256  ;;  %p437_p11 = scmp.lt.s32.totalorder %s619_s29, %s435_s18 }
  0x21   : > { %p432_p0 = pnand %p430_p12, %p416_p13  ;;  %p438_p2 = scmp.lt.s32.totalorder %s436_s19, %s429_s15 }
  0x23   : > { %p433_p10 = pneg %p432_p0  ;;  %p439_p3 = por %p438_p2, %p437_p11 }
  0x25   : > { %p440_p4 = pnand %p439_p3, %p433_p10 }
  0x27   : > { %443 = shalt.err (!%p440_p4)
}
  0x28   : > { %360 = dma.hbm_to_vmem [thread:$0]  (!%p615_p9), %s609_s27, 128, %s619_s29, %s131_s3  }
  0x29   : > { %p727_p1 = scmp.lt.s32.totalorder %s528_s14, 3  ;;  %p728_p5 = scmp.ge.s32.totalorder %s528_s14, 1 }
  0x2a   : > { %s662_s4 = scalar_lea.hbm %s721_s1, %s345_s23  ;;  %s153_s5 = scalar_lea.vmem [#allocation5], %s344_s24 }
  0x2b   : > { %p653_p6 = pnand %p728_p5, %p727_p1  ;;  %s161_s6 = sshll.u32 %s153_s5, 4  ;;  %s162_s6 = int_to_ptr.vmem [resolvable:$true] %s161_s6 }
  0x2c   : > { %s150_s27 = scalar_lea.sflag [#allocation6], %s600_s22  ;;  %s444_s29 = scalar_lea.hbm %s662_s4, 128 }
  0x2d   : > { %s729_s25 = scalar_select %p653_p6, 1, 0 }
  0x2e   : > { %p445_p10 = scmp.ne.s32.totalorder %s662_s4, %s444_s29  ;;  %s449_s23 = scalar_lea.hbm %s721_s1, 256 }
  0x2f   : > { %p450_p12 = scmp.lt.u32.totalorder %s662_s4, %s721_s1  ;;  %p451_p0 = scmp.lt.u32.totalorder %s449_s23, %s444_s29 }
  0x30   : > { %p447_p11 = pnand %p445_p10, %p416_p13  ;;  %p453_p3 = scmp.lt.u32.totalorder %s444_s29, %s662_s4 }
  0x31   : > { %p452_p2 = por %p451_p0, %p450_p12 }
  0x32   : > { %p448_p8 = pneg %p447_p11 }
  0x33   : > { %p454_p4 = por %p453_p3, %p452_p2 }
  0x35   : > { %p455_p1 = pnand %p454_p4, %p448_p8 }
  0x37   : > { %458 = shalt.err (!%p455_p1)
}
  0x38   : > { %s459_s22 = scalar_lea.vmem %s162_s6, 128  ;;  %s531_s24 = smov [#allocation5]  }
  0x39   : > { %p460_p5 = scmp.ne.s32.totalorder %s162_s6, %s459_s22  ;;  %s464_s15 = sshll.u32 %s531_s24, 4  ;;  %s465_s15 = int_to_ptr.vmem [resolvable:$false] %s464_s15 }
  0x3a   : > { %s466_s17 = scalar_lea.vmem %s465_s15, 256  ;;  %p467_p7 = scmp.lt.s32.totalorder %s162_s6, %s465_s15 }
  0x3b   : > { %p462_p10 = pnand %p460_p5, %p416_p13  ;;  %p468_p6 = scmp.lt.s32.totalorder %s466_s17, %s459_s22 }
  0x3d   : > { %p463_p11 = pneg %p462_p10  ;;  %p469_p0 = por %p468_p6, %p467_p7 }
  0x3f   : > { %p470_p12 = pnand %p469_p0, %p463_p11 }
  0x41   : > { %473 = shalt.err (!%p470_p12)
}
  0x42   : > { %363 = dma.hbm_to_vmem [thread:$0]  (!%p615_p9), %s662_s4, 128, %s162_s6, %s150_s27  }
  0x43   : > { %p730_p8 = scmp.ne.s32.totalorder %s729_s25, 0 }
  0x44   : > { %s172_s18 = sand.u32 (!%p730_p8), 1, %s512_s10   ;;  %p731_p13 = scmp.ne.s32.totalorder (!%p730_p8), %s725_s20, 0 }
  0x45   : > { %170 = sbr.rel (%p730_p8) target bundleno = 263 (0x107), region = 28  ;;  %s349_s19 = sshll.u32 (!%p730_p8), %s172_s18, 3 }
  0x46   : > { %s173_s26 = scalar_lea.sflag (!%p730_p8), [#allocation4], %s172_s18  ;;  %s176_s28 = scalar_lea.vmem (!%p730_p8), [#allocation3], %s349_s19 }
  0x4c   : > { %499 = dma.done.wait (%p731_p13), %s173_s26, 128  }
  0x4d   : > { %501 = vsyncadd (%p731_p13), %s173_s26, 4294967168  ;;  %s182_s5 = scalar_lea.sflag [#allocation6], %s172_s18  ;;  %s185_s29 = scalar_lea.vmem [#allocation5], %s349_s19 }
  0x4e   : > { %503 = dma.done.wait (%p731_p13), %s182_s5, 128  }
  0x4f   : > { %505 = vsyncadd (%p731_p13), %s182_s5, 4294967168  ;;  %v532_v0 = vmov 0.0   ;;  %v217_v1 = vld [vmem:[%s185_s29] sm:$0xff]  ;;  %v218_v2 = vld [vmem:[%s176_s28] sm:$0xff]  ;;  %vm236_vm1 = vcmask 1040384   ;;  %p209_p7 = scmp.lt.s32.totalorder %s520_s12, 1 }
  0x50   : > { %216 = vst [vmem:[#allocation2] sm:$0x1] %v532_v0  ;;  %v219_v3 = vsub.f32 %v218_v2, %v217_v1  ;;  %vm221_vm0 = vcmp.ne.f32.partialorder %v217_v1, -1.0  ;;  %vm246_vm2 = vcmask 0  }
  0x51   : > { %s740_s12 = smov (!%p209_p7, %s520_s12), 1 }
  0x52   : > { %v220_v4 = vand.u32 2147483647, %v219_v3  ;;  %s211_s25 = scalar_lea.vmem %s722_s2, %s740_s12 }
  0x54   : > { %v222_v5 = vsel %vm221_vm0, %v220_v4, 0.0 }
  0x55   : > { %v224_v6 = vrot.slane %v222_v5, 4 }
  0x57   : > { %v225_v7 = vadd.f32 %v224_v6, %v222_v5  ;;  %v223_v11 = vld [vmem:[#allocation2] sm:$0x1] }
  0x59   : > { %v226_v8 = vrot.slane %v225_v7, 2 }
  0x5b   : > { %v227_v9 = vadd.f32 %v226_v8, %v225_v7 }
  0x5d   : > { %v228_v10 = vrot.slane %v227_v9, 1 }
  0x5f   : > { %v229_v12 = vadd.f32 %v228_v10, %v227_v9 }
  0x61   : > { %v230_v13 = vadd.f32 %v229_v12, %v223_v11 }
  0x63   : > { %231 = vst [vmem:[#allocation2] sm:$0x1] %v230_v13 }
  0x6a   : > { %v235_v14 = vld [vmem:[#allocation2] sm:$0x1] }
  0x6b   : > { %v237_v15 = vsel %vm236_vm1, %v235_v14, 0.0 }
  0x6c   : > { %238 = vadd.xlane.f32.xlu0 %v237_v15 }
  0xf9   : > { %v239_v16 = vpop.xlane.xlu0 %238 }
  0xfa   : > { %v240_v17 = vrot.slane %v239_v16, 4 }
  0xfc   : > { %v241_v18 = vadd.f32 %v240_v17, %v239_v16 }
  0xfe   : > { %v242_v19 = vrot.slane %v241_v18, 2 }
 0x100   : > { %v243_v20 = vadd.f32 %v242_v19, %v241_v18 }
 0x102   : > { %v244_v21 = vrot.slane %v243_v20, 1 }
 0x104   : > { %v245_v22 = vadd.f32 %v244_v21, %v243_v20 }
 0x106   : > { %247 = vst.msk [vmem:[%s211_s25] sm:$0x1] %vm246_vm2, %v245_v22 }
 0x107 PF: > { %s18_s14 = sadd.s32 1, %s528_s14   ;;  %s732_s9 = smov %s512_s10 }
 0x108   : > { %p15_p9 = scmp.ge.s32.totalorder %s18_s14, 4   ;;  %s733_s10 = smov %s516_s11 }
 0x109   : > { %s734_s11 = smov %s597_s21  ;;  %s735_s12 = smov %s524_s13 }
 0x10a   : > { %s736_s13 = smov %s738_s16  ;;  %17 = sbr.rel (!%p15_p9) target bundleno = 6 (0x6), region = 89 }
 0x111   :  { %265 = vsyncpa [#allocation4], 1 }
 0x112   :  { %267 = vsyncpa [#allocation4 + $0x1], 1 }
 0x113   :  { %268 = vsyncpa [#allocation6], 1 }
 0x114   :  { %270 = vsyncpa [#allocation6 + $0x1], 1 }

</bundles_post_ra>
